<compile_context>
chip_gen: v7x
topology: tpu7x:2x2x1
jax: 0.10.0
libtpu: 0.0.40
codegen_flags: <defaults>
</compile_context>

<pallas_src>
import jax
import jax.numpy as jnp
from jax.experimental import pallas as pl
from jax.experimental.pallas import tpu as pltpu

K = 7      # spatial conv kernel size
PAD = 3    # spatial conv padding


def sca_kernel(x_ref, w1_ref, w2_ref, convm_ref, o_ref, ca_scr, cx_scr, s_scr):
    # x_ref  : (Bt, C, HW)   VMEM, lane-dense        o_ref : (Bt, C, HW) VMEM
    # w1_ref : (CH, C) f32   (1x1 conv #1)           w2_ref: (C, CH) f32 (1x1 conv #2)
    # convm_ref: (2*HW, HW) bf16  7x7 conv as a stacked Toeplitz matrix [avg; max]
    # ca_scr : (C, Bt) f32   per-image avg-pooled channels (columns)
    # cx_scr : (C, Bt) f32   per-image max-pooled channels (columns)
    # s_scr  : (Bt, 2*HW) f32  per-image [avg_s | max_s] spatial rows
    block_b = x_ref.shape[0]
    hw = x_ref.shape[2]

    # ---- pass 1: per-image pooled statistics into staging scratch ------------
    # Only proven 2-D reductions; nothing large is carried across iterations, so
    # the unrolled loop keeps vreg pressure at ~1 image.
    for b in range(block_b):
        xb = x_ref[b].astype(jnp.float32)                                  # (C, HW)
        ca_scr[:, pl.ds(b, 1)] = jnp.mean(xb, axis=1, keepdims=True)       # (C, 1)
        cx_scr[:, pl.ds(b, 1)] = jnp.max(xb, axis=1, keepdims=True)        # (C, 1)
        s_scr[pl.ds(b, 1), pl.ds(0, hw)] = jnp.mean(xb, axis=0, keepdims=True)  # (1, HW)
        s_scr[pl.ds(b, 1), pl.ds(hw, hw)] = jnp.max(xb, axis=0, keepdims=True)  # (1, HW)

    # ---- pass 2: batched matmuls (one set per BLOCK, not per image) ----------
    # Channel MLP, column-oriented:  sigmoid(W2 @ (relu(W1@avg) + relu(W1@max)))
    w1 = w1_ref[...]                                                       # (CH, C)
    w2 = w2_ref[...]                                                       # (C, CH)
    h = (jnp.maximum(jnp.dot(w1, ca_scr[...], preferred_element_type=jnp.float32), 0.0)
         + jnp.maximum(jnp.dot(w1, cx_scr[...], preferred_element_type=jnp.float32), 0.0))
    ch_att = jax.nn.sigmoid(
        jnp.dot(w2, h, preferred_element_type=jnp.float32))                # (C, Bt)

    # Spatial 7x7 conv: single bf16 MXU matmul against the stacked Toeplitz RHS.
    sp_logit = jnp.dot(s_scr[...].astype(jnp.bfloat16), convm_ref[...],
                       preferred_element_type=jnp.float32)                 # (Bt, HW)
    sp_att = jax.nn.sigmoid(sp_logit)                                      # (Bt, HW)

    # ---- pass 3: per-image apply + lane-dense writeback ----------------------
    for b in range(block_b):
        xb = x_ref[b].astype(jnp.float32)                                  # (C, HW)
        ch_b = ch_att[:, b:b + 1]                                          # (C, 1)
        sp_b = sp_att[b:b + 1, :]                                          # (1, HW)
        o_ref[b] = (xb * ch_b * sp_b).astype(o_ref.dtype)


def _spatial_conv_as_matmul(w_spatial, H, W):
    """Repack the (1, 2, K, K) conv weight (zero padding folded in) into a stacked
    (2*H*W, H*W) matrix M so that conv(avg, max) == [avg_flat | max_flat] @ M."""
    k = w_spatial.shape[-1]
    pad = (k - 1) // 2
    hw = H * W
    q = jnp.arange(hw)                                   # source flat index
    p = jnp.arange(hw)                                   # destination flat index
    di = (q // W)[:, None] - (p // W)[None, :]
    dj = (q % W)[:, None] - (p % W)[None, :]
    valid = (jnp.abs(di) <= pad) & (jnp.abs(dj) <= pad)
    ki = jnp.clip(di + pad, 0, k - 1)
    kj = jnp.clip(dj + pad, 0, k - 1)
    w = w_spatial[0].astype(jnp.float32)                 # (2, K, K)
    taps = w[:, ki, kj]                                  # (2, HW, HW)
    m = jnp.where(valid[None], taps, 0.0)                # (2, HW, HW)
    return m.reshape(2 * hw, hw)                         # rows [0:HW)=avg, [HW:2HW)=max


def spatial_channel_attention(x, w1, w2, w_spatial, *, block_b=None):
    """x: (B, C, H, W); w1: (CH, C); w2: (C, CH); w_spatial: (1, 2, K, K)."""
    B, C, H, W = x.shape
    HW = H * W
    CH = w1.shape[0]

    # Toeplitz-path guard: (2*HW, HW) bf16 RHS grows quadratically with HW and
    # would exceed v7x's 64 MiB VMEM for large spatial sizes.
    if 2 * HW * HW * 2 > (8 << 20):
        # TODO(synk): fall back to a shifted-accumulation 7x7 conv (pltpu.roll /
        # banded-tiled matmul) for large H*W instead of the dense Toeplitz matmul.
        raise NotImplementedError("Spatial size too large for the Toeplitz matmul path.")

    x_flat = x.reshape(B, C, HW)                          # free contiguous reshape
    conv_mat = _spatial_conv_as_matmul(
        jnp.asarray(w_spatial, jnp.float32), H, W).astype(jnp.bfloat16)   # (2HW, HW) bf16
    w1 = jnp.asarray(w1, jnp.float32)
    w2 = jnp.asarray(w2, jnp.float32)

    per_image = 2 * C * HW * x.dtype.itemsize             # in + out HBM bytes / image
    if block_b is None:
        # Big enough to amortize the ~0.35us/step overhead (~1-2 MiB per step),
        # small enough that double-buffered in/out blocks stay well under VMEM,
        # and capped at B//2 so grid >= 2 (both v7x TensorCores get work).
        cap = min(32, max(1, (8 << 20) // max(per_image, 1)))
        block_b = min(B, cap)
        if B >= 2:
            block_b = min(block_b, max(1, B // 2))
    block_b = int(block_b)
    while B % block_b:
        block_b -= 1
    grid = (B // block_b,)

    # Explicit scoped-VMEM budget (double-buffered x/out blocks + weights + scratch).
    block_bytes = block_b * C * HW * x.dtype.itemsize
    est = (4 * block_bytes                                   # 2 bufs in + 2 bufs out
           + 2 * conv_mat.size * conv_mat.dtype.itemsize     # Toeplitz RHS (x2 buffers)
           + 2 * (w1.size + w2.size) * 4                     # MLP weights (x2 buffers)
           + 4 * (2 * C * block_b + block_b * 2 * HW))       # staging scratch
    vmem_limit = int(min(max(2 * est, 16 << 20), 32 << 20))

    out_flat = pl.pallas_call(
        sca_kernel,
        out_shape=jax.ShapeDtypeStruct((B, C, HW), x.dtype),
        grid_spec=pltpu.PrefetchScalarGridSpec(
            num_scalar_prefetch=0,
            grid=grid,
            in_specs=[
                pl.BlockSpec((block_b, C, HW), lambda g: (g, 0, 0)),
                pl.BlockSpec((CH, C), lambda g: (0, 0)),
                pl.BlockSpec((C, CH), lambda g: (0, 0)),
                pl.BlockSpec((2 * HW, HW), lambda g: (0, 0)),
            ],
            out_specs=pl.BlockSpec((block_b, C, HW), lambda g: (g, 0, 0)),
            scratch_shapes=[
                pltpu.VMEM((C, block_b), jnp.float32),        # avg-pooled channels
                pltpu.VMEM((C, block_b), jnp.float32),        # max-pooled channels
                pltpu.VMEM((block_b, 2 * HW), jnp.float32),   # [avg_s | max_s] rows
            ],
        ),
        compiler_params=pltpu.CompilerParams(
            dimension_semantics=("parallel",),
            vmem_limit_bytes=vmem_limit),
    )(x_flat, w1, w2, conv_mat)
    return out_flat.reshape(B, C, H, W)


def reference(x, w1, w2, w_spatial):
    """Pure-JAX mirror of the PyTorch forward (for correctness checking)."""
    avg_p = jnp.mean(x, axis=(2, 3))                      # (B, C)
    max_p = jnp.max(x, axis=(2, 3))                       # (B, C)

    def fc(v):
        h = jax.nn.relu(jnp.dot(v, w1.T, precision=jax.lax.Precision.HIGHEST))
        return jnp.dot(h, w2.T, precision=jax.lax.Precision.HIGHEST)

    ch = jax.nn.sigmoid(fc(avg_p) + fc(max_p))[:, :, None, None]    # (B, C, 1, 1)

    avg_s = jnp.mean(x, axis=1, keepdims=True)
    max_s = jnp.max(x, axis=1, keepdims=True)
    s_in = jnp.concatenate([avg_s, max_s], axis=1)        # (B, 2, H, W)
    sp = jax.lax.conv_general_dilated(
        s_in, w_spatial, window_strides=(1, 1),
        padding=[(PAD, PAD), (PAD, PAD)],
        dimension_numbers=("NCHW", "OIHW", "NCHW"),
        precision=jax.lax.Precision.HIGHEST)
    sp = jax.nn.sigmoid(sp)                               # (B, 1, H, W)
    return x * ch * sp


if __name__ == "__main__":
    # Small shapes consistent with the module: in_channels=32, reduction=4 -> hidden=8.
    B, C, H, W = 2, 32, 16, 16
    reduction_ratio = 4
    CH = C // reduction_ratio

    key = jax.random.PRNGKey(0)
    k1, k2, k3, k4 = jax.random.split(key, 4)
    x = jax.random.normal(k1, (B, C, H, W), jnp.float32)
    # channel_fc Conv2d weights: (CH, C, 1, 1) and (C, CH, 1, 1), squeezed to 2-D.
    w1 = jax.random.normal(k2, (CH, C), jnp.float32) * 0.1
    w2 = jax.random.normal(k3, (C, CH), jnp.float32) * 0.1
    # spatial Conv2d weight: (out=1, in=2, 7, 7), no bias.
    w_spatial = jax.random.normal(k4, (1, 2, K, K), jnp.float32) * 0.1

    fwd = jax.jit(spatial_channel_attention)
    out = jax.block_until_ready(fwd(x, w1, w2, w_spatial))

    ref = reference(x, w1, w2, w_spatial)
    max_err = float(jnp.max(jnp.abs(out - ref)))
    assert out.shape == x.shape and out.dtype == x.dtype
    # The 7x7 spatial conv runs as a bf16 MXU matmul in-kernel (f32 accumulation),
    # so allow a slightly looser tolerance than pure-f32.
    assert jnp.allclose(out, ref, atol=1e-2, rtol=1e-2), f"max abs err {max_err}"
    print("KERNEL_OK")
</pallas_src>

<mosaic_0001>
module attributes {stable_mosaic.version = 11 : i64} {
  func.func @sca_kernel(%arg0: i32, %arg1: memref<1x32x256xf32, #tpu.memory_space<vmem>>, %arg2: memref<8x32xf32, #tpu.memory_space<vmem>>, %arg3: memref<32x8xf32, #tpu.memory_space<vmem>>, %arg4: memref<512x256xbf16, #tpu.memory_space<vmem>>, %arg5: memref<1x32x256xf32, #tpu.memory_space<vmem>>, %arg6: memref<32x1xf32, #tpu.memory_space<vmem>>, %arg7: memref<32x1xf32, #tpu.memory_space<vmem>>, %arg8: memref<1x512xf32, #tpu.memory_space<vmem>>) attributes {dimension_semantics = [#tpu.dimension_semantics<parallel>], iteration_bounds = array<i64: 2>, scalar_prefetch = 0 : i64, scratch_operands = 3 : i64, tpu.core_type = #tpu.core_type<tc>, window_params = [{transform_indices = @transform_0, window_bounds = array<i64: 1, 32, 256>}, {pipeline_mode = #tpu.pipeline_mode<synchronous>, transform_indices = @transform_1, window_bounds = array<i64: 8, 32>}, {pipeline_mode = #tpu.pipeline_mode<synchronous>, transform_indices = @transform_2, window_bounds = array<i64: 32, 8>}, {pipeline_mode = #tpu.pipeline_mode<synchronous>, transform_indices = @transform_3, window_bounds = array<i64: 512, 256>}, {transform_indices = @transform_4, window_bounds = array<i64: 1, 32, 256>}]} {
    %c0 = arith.constant 0 : index
    %c0_0 = arith.constant 0 : index
    %c0_1 = arith.constant 0 : index
    %0 = vector.load %arg1[%c0, %c0_0, %c0_1] : memref<1x32x256xf32, #tpu.memory_space<vmem>>, vector<1x32x256xf32>
    %1 = vector.shape_cast %0 : vector<1x32x256xf32> to vector<32x256xf32>
    %cst = arith.constant dense<0.000000e+00> : vector<32xf32>
    %2 = vector.multi_reduction <add>, %1, %cst [1] : vector<32x256xf32> to vector<32xf32>
    %3 = vector.shape_cast %2 : vector<32xf32> to vector<32x1xf32>
    %cst_2 = arith.constant 2.560000e+02 : f32
    %4 = vector.broadcast %cst_2 : f32 to vector<32x1xf32>
    %5 = arith.divf %3, %4 : vector<32x1xf32>
    %c0_3 = arith.constant 0 : index
    %c0_4 = arith.constant 0 : index
    %6 = vector.load %arg6[%c0_3, %c0_4] : memref<32x1xf32, #tpu.memory_space<vmem>>, vector<32x1xf32>
    tpu.vector_store %arg6[%c0_3, %c0_4], %5 {strides = array<i32>} : memref<32x1xf32, #tpu.memory_space<vmem>>, vector<32x1xf32>,
    %cst_5 = arith.constant dense<0xFF800000> : vector<32xf32>
    %7 = vector.multi_reduction <maximumf>, %1, %cst_5 [1] : vector<32x256xf32> to vector<32xf32>
    %8 = vector.shape_cast %7 : vector<32xf32> to vector<32x1xf32>
    %c0_6 = arith.constant 0 : index
    %c0_7 = arith.constant 0 : index
    %9 = vector.load %arg7[%c0_6, %c0_7] : memref<32x1xf32, #tpu.memory_space<vmem>>, vector<32x1xf32>
    tpu.vector_store %arg7[%c0_6, %c0_7], %8 {strides = array<i32>} : memref<32x1xf32, #tpu.memory_space<vmem>>, vector<32x1xf32>,
    %cst_8 = arith.constant dense<0.000000e+00> : vector<256xf32>
    %10 = vector.multi_reduction <add>, %1, %cst_8 [0] : vector<32x256xf32> to vector<256xf32>
    %11 = vector.shape_cast %10 : vector<256xf32> to vector<1x256xf32>
    %cst_9 = arith.constant 3.200000e+01 : f32
    %12 = vector.broadcast %cst_9 : f32 to vector<1x256xf32>
    %13 = arith.divf %11, %12 : vector<1x256xf32>
    %c0_10 = arith.constant 0 : index
    %c0_11 = arith.constant 0 : index
    %14 = vector.load %arg8[%c0_10, %c0_11] : memref<1x512xf32, #tpu.memory_space<vmem>>, vector<1x256xf32>
    tpu.vector_store %arg8[%c0_10, %c0_11], %13 {strides = array<i32>} : memref<1x512xf32, #tpu.memory_space<vmem>>, vector<1x256xf32>,
    %cst_12 = arith.constant dense<0xFF800000> : vector<256xf32>
    %15 = vector.multi_reduction <maximumf>, %1, %cst_12 [0] : vector<32x256xf32> to vector<256xf32>
    %16 = vector.shape_cast %15 : vector<256xf32> to vector<1x256xf32>
    %c0_13 = arith.constant 0 : index
    %c256 = arith.constant 256 : index
    %17 = vector.load %arg8[%c0_13, %c256] : memref<1x512xf32, #tpu.memory_space<vmem>>, vector<1x256xf32>
    tpu.vector_store %arg8[%c0_13, %c256], %16 {strides = array<i32>} : memref<1x512xf32, #tpu.memory_space<vmem>>, vector<1x256xf32>,
    %c0_14 = arith.constant 0 : index
    %c0_15 = arith.constant 0 : index
    %18 = vector.load %arg2[%c0_14, %c0_15] : memref<8x32xf32, #tpu.memory_space<vmem>>, vector<8x32xf32>
    %c0_16 = arith.constant 0 : index
    %c0_17 = arith.constant 0 : index
    %19 = vector.load %arg3[%c0_16, %c0_17] : memref<32x8xf32, #tpu.memory_space<vmem>>, vector<32x8xf32>
    %c0_18 = arith.constant 0 : index
    %c0_19 = arith.constant 0 : index
    %20 = vector.load %arg6[%c0_18, %c0_19] : memref<32x1xf32, #tpu.memory_space<vmem>>, vector<32x1xf32>
    %cst_20 = arith.constant dense<0.000000e+00> : vector<8x1xf32>
    %21 = tpu.matmul %18, %20, %cst_20 {dimension_numbers = #tpu.dot_dimension_numbers<[1], [0], [0], [1], [0, 0, 1, 1], [], []>} : vector<8x32xf32>, vector<32x1xf32>, vector<8x1xf32> -> vector<8x1xf32>
    %cst_21 = arith.constant 0.000000e+00 : f32
    %22 = vector.broadcast %cst_21 : f32 to vector<8x1xf32>
    %23 = arith.maximumf %21, %22 : vector<8x1xf32>
    %c0_22 = arith.constant 0 : index
    %c0_23 = arith.constant 0 : index
    %24 = vector.load %arg7[%c0_22, %c0_23] : memref<32x1xf32, #tpu.memory_space<vmem>>, vector<32x1xf32>
    %cst_24 = arith.constant dense<0.000000e+00> : vector<8x1xf32>
    %25 = tpu.matmul %18, %24, %cst_24 {dimension_numbers = #tpu.dot_dimension_numbers<[1], [0], [0], [1], [0, 0, 1, 1], [], []>} : vector<8x32xf32>, vector<32x1xf32>, vector<8x1xf32> -> vector<8x1xf32>
    %cst_25 = arith.constant 0.000000e+00 : f32
    %26 = vector.broadcast %cst_25 : f32 to vector<8x1xf32>
    %27 = arith.maximumf %25, %26 : vector<8x1xf32>
    %28 = arith.addf %23, %27 : vector<8x1xf32>
    %cst_26 = arith.constant dense<0.000000e+00> : vector<32x1xf32>
    %29 = tpu.matmul %19, %28, %cst_26 {dimension_numbers = #tpu.dot_dimension_numbers<[1], [0], [0], [1], [0, 0, 1, 1], [], []>} : vector<32x8xf32>, vector<8x1xf32>, vector<32x1xf32> -> vector<32x1xf32>
    %30 = arith.negf %29 : vector<32x1xf32>
    %31 = math.exp %30 : vector<32x1xf32>
    %cst_27 = arith.constant 1.000000e+00 : f32
    %32 = vector.broadcast %cst_27 : f32 to vector<32x1xf32>
    %33 = arith.addf %32, %31 : vector<32x1xf32>
    %34 = arith.divf %32, %33 : vector<32x1xf32>
    %c0_28 = arith.constant 0 : index
    %c0_29 = arith.constant 0 : index
    %35 = vector.load %arg8[%c0_28, %c0_29] : memref<1x512xf32, #tpu.memory_space<vmem>>, vector<1x512xf32>
    %36 = arith.truncf %35 : vector<1x512xf32> to vector<1x512xbf16>
    %c0_30 = arith.constant 0 : index
    %c0_31 = arith.constant 0 : index
    %37 = vector.load %arg4[%c0_30, %c0_31] : memref<512x256xbf16, #tpu.memory_space<vmem>>, vector<512x256xbf16>
    %cst_32 = arith.constant dense<0.000000e+00> : vector<1x256xf32>
    %38 = tpu.matmul %36, %37, %cst_32 {dimension_numbers = #tpu.dot_dimension_numbers<[1], [0], [0], [1], [0, 0, 1, 1], [], []>} : vector<1x512xbf16>, vector<512x256xbf16>, vector<1x256xf32> -> vector<1x256xf32>
    %39 = arith.negf %38 : vector<1x256xf32>
    %40 = math.exp %39 : vector<1x256xf32>
    %cst_33 = arith.constant 1.000000e+00 : f32
    %41 = vector.broadcast %cst_33 : f32 to vector<1x256xf32>
    %42 = arith.addf %41, %40 : vector<1x256xf32>
    %43 = arith.divf %41, %42 : vector<1x256xf32>
    %c0_34 = arith.constant 0 : index
    %c0_35 = arith.constant 0 : index
    %c0_36 = arith.constant 0 : index
    %44 = vector.load %arg1[%c0_34, %c0_35, %c0_36] : memref<1x32x256xf32, #tpu.memory_space<vmem>>, vector<1x32x256xf32>
    %45 = vector.shape_cast %44 : vector<1x32x256xf32> to vector<32x256xf32>
    %46 = vector.broadcast %34 : vector<32x1xf32> to vector<32x256xf32>
    %47 = arith.mulf %45, %46 : vector<32x256xf32>
    %48 = vector.broadcast %43 : vector<1x256xf32> to vector<32x256xf32>
    %49 = arith.mulf %47, %48 : vector<32x256xf32>
    %c0_37 = arith.constant 0 : index
    %c0_38 = arith.constant 0 : index
    %c0_39 = arith.constant 0 : index
    %50 = vector.load %arg5[%c0_37, %c0_38, %c0_39] : memref<1x32x256xf32, #tpu.memory_space<vmem>>, vector<1x32x256xf32>
    %51 = vector.shape_cast %50 : vector<1x32x256xf32> to vector<32x256xf32>
    %52 = vector.shape_cast %49 : vector<32x256xf32> to vector<1x32x256xf32>
    tpu.vector_store %arg5[%c0_37, %c0_38, %c0_39], %52 {strides = array<i32>} : memref<1x32x256xf32, #tpu.memory_space<vmem>>, vector<1x32x256xf32>,
    return
  }
  func.func @transform_0(%arg0: i32) -> (i32, i32, i32) {
    %c0_i32 = arith.constant 0 : i32
    %c0_i32_0 = arith.constant 0 : i32
    %c0_i32_1 = arith.constant 0 : i32
    return %arg0, %c0_i32, %c0_i32_0 : i32, i32, i32
  }
  func.func @transform_1(%arg0: i32) -> (i32, i32) {
    %c0_i32 = arith.constant 0 : i32
    %c0_i32_0 = arith.constant 0 : i32
    %c0_i32_1 = arith.constant 0 : i32
    return %c0_i32, %c0_i32_0 : i32, i32
  }
  func.func @transform_2(%arg0: i32) -> (i32, i32) {
    %c0_i32 = arith.constant 0 : i32
    %c0_i32_0 = arith.constant 0 : i32
    %c0_i32_1 = arith.constant 0 : i32
    return %c0_i32, %c0_i32_0 : i32, i32
  }
  func.func @transform_3(%arg0: i32) -> (i32, i32) {
    %c0_i32 = arith.constant 0 : i32
    %c0_i32_0 = arith.constant 0 : i32
    %c0_i32_1 = arith.constant 0 : i32
    return %c0_i32, %c0_i32_0 : i32, i32
  }
  func.func @transform_4(%arg0: i32) -> (i32, i32, i32) {
    %c0_i32 = arith.constant 0 : i32
    %c0_i32_0 = arith.constant 0 : i32
    %c0_i32_1 = arith.constant 0 : i32
    return %arg0, %c0_i32, %c0_i32_0 : i32, i32, i32
  }
}

</mosaic_0001>

<bundles_post_ra>
// kernel: spatial_channel_attention.1
= control target key start
LH: loop header
LB: loop body
LE: loop exit
PB: predicated region body
PF: predicated region fallthrough
CT: control target
= control target key end

     0   :  { %s1547_s15 = smov 0   ;;  %s1864_s0 = inlined_call_operand.vmem [shape: f32[2,32,256], index: 0, kind: input, shape index: {}]   ;;  %s1865_s1 = inlined_call_operand.vmem [shape: f32[8,32], index: 1, kind: input, shape index: {}]   ;;  %s1866_s2 = inlined_call_operand.vmem [shape: f32[32,8], index: 2, kind: input, shape index: {}]   ;;  %s1867_s3 = inlined_call_operand.vmem [shape: bf16[512,256], index: 3, kind: input, shape index: {}]   ;;  %s1868_s4 = inlined_call_operand.vmem [shape: f32[2,32,256], index: 4, kind: output, shape index: {}]  }
   0x1 LB: > { %s1226_s16 = sadd.s32 4294967295, %s1515_s15   ;;  %p1230_p0 = scmp.ge.s32.totalorder %s1515_s15, 1  ;;  %s1515_s15 = sphi %s1547_s15, %s14_s15  }
   0x2   : > { %p162_p1 = scmp.lt.s32.totalorder %s1515_s15, 3 }
   0x4   : > { %p163_p2 = pnand %p1230_p0, %p162_p1 }
   0x5   : > { %p188_p3 = scmp.lt.s32.totalorder (!%p163_p2), %s1226_s16, 1  ;;  %v1517_v16 = vmov (!%p163_p2), 0.0|0.0   ;;  %vm1518_vm0 = vmmov (!%p163_p2), 0   ;;  %v1519_v17 = vmov (!%p163_p2), 0.0   ;;  %vm223_vm1 = vcmask (!%p163_p2), 7168   ;;  %v325_v42 = vld [vmem:[%s1865_s1] sm:$0xff] (!%p163_p2) }
   0x6   : > { %166 = sbr.rel (%p163_p2) target bundleno = 784 (0x310), region = 36  ;;  %1366 = vmatprep.subr.bf16.mxu1 (!%p163_p2), %v1517_v16  ;;  %1360 = vmatprep.subr.bf16.mxu0 (!%p163_p2), %v1517_v16  ;;  %vm334_vm2 = vcmask (!%p163_p2), 261120   ;;  %v326_v43 = vld [vmem:[%s1866_s2] sm:$0xff] (!%p163_p2)  ;;  %vm485_vm3 = vcmask (!%p163_p2), 64512   ;;  %v1400_v46 = vld [vmem:[%s1867_s3 + $0x114] ss:$8 sps:$4 sm:$0xff] (!%p163_p2)  }
   0x7   : > { %1338 = vmatprep.mubr.msk.f32.mxu0 (!%p163_p2), %vm1518_vm0, %v1519_v17  ;;  %1349 = vmatprep.mubr.msk.f32.mxu1 (!%p163_p2), %vm1518_vm0, %v1519_v17  ;;  %v1392_v44 = vld [vmem:[%s1867_s3 + $0x100] ss:$8 sps:$4 sm:$0xff] (!%p163_p2)   ;;  %v1394_v45 = vld [vmem:[%s1867_s3 + $0x104] ss:$8 sps:$4 sm:$0xff] (!%p163_p2)   ;;  %v1398_v47 = vld [vmem:[%s1867_s3 + $0x110] ss:$8 sps:$4 sm:$0xff] (!%p163_p2)  }
   0x8   : > { %v1406_v48 = vld [vmem:[%s1867_s3 + $0x124] ss:$8 sps:$4 sm:$0xff] (!%p163_p2)   ;;  %v1404_v49 = vld [vmem:[%s1867_s3 + $0x120] ss:$8 sps:$4 sm:$0xff] (!%p163_p2)   ;;  %v1412_v50 = vld [vmem:[%s1867_s3 + $0x134] ss:$8 sps:$4 sm:$0xff] (!%p163_p2)  }
   0x9   : > { %v1410_v51 = vld [vmem:[%s1867_s3 + $0x130] ss:$8 sps:$4 sm:$0xff] (!%p163_p2)   ;;  %v1418_v52 = vld [vmem:[%s1867_s3 + $0x144] ss:$8 sps:$4 sm:$0xff] (!%p163_p2)   ;;  %v1416_v53 = vld [vmem:[%s1867_s3 + $0x140] ss:$8 sps:$4 sm:$0xff] (!%p163_p2)  }
   0xa   : > { %v1424_v54 = vld [vmem:[%s1867_s3 + $0x154] ss:$8 sps:$4 sm:$0xff] (!%p163_p2)   ;;  %v1422_v57 = vld [vmem:[%s1867_s3 + $0x150] ss:$8 sps:$4 sm:$0xff] (!%p163_p2)   ;;  %v1430_v58 = vld [vmem:[%s1867_s3 + $0x164] ss:$8 sps:$4 sm:$0xff] (!%p163_p2)  }
   0xb   : > { %v1428_v61 = vld [vmem:[%s1867_s3 + $0x160] ss:$8 sps:$4 sm:$0xff] (!%p163_p2)   ;;  %v1436_v62 = vld [vmem:[%s1867_s3 + $0x174] ss:$8 sps:$4 sm:$0xff] (!%p163_p2)  }
   0xd   : > { %s1870_s16 = smov (!%p188_p3, %s1226_s16), 1 }
   0xe   : > { %s1313_s17 = sshll.u32 %s1870_s16, 6 }
   0xf   : > { %s192_s20 = scalar_lea.vmem %s1864_s0, %s1313_s17  ;;  %s197_s23 = scalar_lea.vmem %s1868_s4, %s1313_s17 }
  0x10   : > { %v1563_v0 = vld [vmem:[%s192_s20] sm:$0xff]  ;;  %v1565_v1 = vld [vmem:[%s192_s20 + $0x8] sm:$0xff]  ;;  %v1567_v2 = vld [vmem:[%s192_s20 + $0x10] sm:$0xff] }
  0x11   : > { %v228_v3 = vmax.f32 %v1563_v0, %v1565_v1  ;;  %v206_v4 = vadd.f32 %v1565_v1, %v1563_v0  ;;  %v1573_v5 = vld [vmem:[%s192_s20 + $0x18] sm:$0xff]  ;;  %v1575_v6 = vld [vmem:[%s192_s20 + $0x30] sm:$0xff]  ;;  %v1579_v8 = vld [vmem:[%s192_s20 + $0x20] sm:$0xff]  ;;  %v244_v55 = vadd.f32 %v1567_v2, %v1563_v0 }
  0x12   : > { %v1577_v7 = vld [vmem:[%s192_s20 + $0x38] sm:$0xff]  ;;  %v1581_v9 = vld [vmem:[%s192_s20 + $0x28] sm:$0xff]  ;;  %v231_v10 = vmax.f32 %v1567_v2, %v1573_v5  ;;  %v209_v11 = vadd.f32 %v1573_v5, %v1567_v2  ;;  %v253_v56 = vadd.f32 %v1573_v5, %v1565_v1  ;;  %v289_v63 = vmax.f32 %v1567_v2, %v1575_v6 }
  0x13   : > { %229 = vmax.xlane.f32.xlu1 %v228_v3  ;;  %207 = vadd.xlane.f32.xlu0 %v206_v4  ;;  %v215_v12 = vadd.f32 %v1577_v7, %v1575_v6  ;;  %v212_v13 = vadd.f32 %v1581_v9, %v1579_v8  ;;  %v237_v14 = vmax.f32 %v1575_v6, %v1577_v7 }
  0x14   : > { %v234_v15 = vmax.f32 %v1579_v8, %v1581_v9  ;;  %v245_v59 = vadd.f32 %v244_v55, %v1579_v8  ;;  %v254_v60 = vadd.f32 %v253_v56, %v1581_v9  ;;  %v298_v3 = vmax.f32 %v1573_v5, %v1577_v7  ;;  %v1476_v55 = vld [vmem:[%s1867_s3 + $0x1e0] ss:$8 sps:$4 sm:$0xff]   ;;  %v1484_v56 = vld [vmem:[%s1867_s3 + $0x1f4] ss:$8 sps:$4 sm:$0xff]  }
  0x16   : > { %v246_v4 = vadd.f32 %v245_v59, %v1575_v6 }
  0x17   : > { %232 = vmax.xlane.f32.xlu1 %v231_v10  ;;  %210 = vadd.xlane.f32.xlu0 %v209_v11  ;;  %v255_v10 = vadd.f32 %v254_v60, %v1577_v7  ;;  %v288_v11 = vmax.f32 %v1563_v0, %v1579_v8 }
  0x19   : > { %v290_v17 = vmax.f32 %v288_v11, %v289_v63  ;;  %v1482_v63 = vld [vmem:[%s1867_s3 + $0x1f0] ss:$8 sps:$4 sm:$0xff]  }
  0x1b   : > { %216 = vadd.xlane.f32.xlu1 %v215_v12  ;;  %213 = vadd.xlane.f32.xlu0 %v212_v13  ;;  %v297_v12 = vmax.f32 %v1565_v1, %v1581_v9  ;;  %v1434_v13 = vld [vmem:[%s1867_s3 + $0x170] ss:$8 sps:$4 sm:$0xff]  }
  0x1f   : > { %238 = vmax.xlane.f32.xlu1 %v237_v14  ;;  %235 = vmax.xlane.f32.xlu0 %v234_v15  ;;  %v1442_v14 = vld [vmem:[%s1867_s3 + $0x184] ss:$8 sps:$4 sm:$0xff]   ;;  %v247_v15 = vrot.slane %v246_v4, 4 }
  0xa0   : > { %v230_v18 = vpop.xlane.xlu1 %229  ;;  %v208_v19 = vpop.xlane.xlu0 %207 }
  0xa1   : > { %240 = vst.msk [vmem:[#allocation3] sm:$0xff] %vm223_vm1, %v230_v18  ;;  %v219_v20 = vmul.f32 0.00390625, %v208_v19  ;;  %v299_v18 = vmax.f32 %v297_v12, %v298_v3  ;;  %v1440_v19 = vld [vmem:[%s1867_s3 + $0x180] ss:$8 sps:$4 sm:$0xff]  }
  0xa3   : > { %224 = vst.msk [vmem:[#allocation2] sm:$0xff] %vm223_vm1, %v219_v20  ;;  %v1448_v20 = vld [vmem:[%s1867_s3 + $0x194] ss:$8 sps:$4 sm:$0xff]  }
  0xa4   : > { %v233_v21 = vpop.xlane.xlu1 %232  ;;  %v211_v22 = vpop.xlane.xlu0 %210 }
  0xa5   : > { %241 = vst.msk [vmem:[#allocation3 + $0x8] sm:$0xff] %vm223_vm1, %v233_v21  ;;  %v220_v23 = vmul.f32 0.00390625, %v211_v22  ;;  %v248_v21 = vadd.f32 %v247_v15, %v246_v4 }
  0xa7   : > { %225 = vst.msk [vmem:[#allocation2 + $0x8] sm:$0xff] %vm223_vm1, %v220_v23  ;;  %v291_v23 = vrot.slane %v290_v17, 4 }
  0xa8   : > { %v217_v24 = vpop.xlane.xlu1 %216  ;;  %v214_v25 = vpop.xlane.xlu0 %213  ;;  %v409_v30 = vld [vmem:[#allocation3] sm:$0xff] }
  0xa9   : > { %v222_v26 = vmul.f32 0.00390625, %v217_v24  ;;  %v221_v27 = vmul.f32 0.00390625, %v214_v25  ;;  %v300_v24 = vrot.slane %v299_v18, 4  ;;  %v1446_v25 = vld [vmem:[%s1867_s3 + $0x190] ss:$8 sps:$4 sm:$0xff]  }
  0xaa   : > { %v330_v33 = vld [vmem:[#allocation2] sm:$0xff] }
  0xab   : > { %227 = vst.msk [vmem:[#allocation2 + $0x18] sm:$0xff] %vm223_vm1, %v222_v26  ;;  %226 = vst.msk [vmem:[#allocation2 + $0x10] sm:$0xff] %vm223_vm1, %v221_v27  ;;  %v1454_v26 = vld [vmem:[%s1867_s3 + $0x1a4] ss:$8 sps:$4 sm:$0xff]   ;;  %v249_v27 = vrot.slane %v248_v21, 2 }
  0xac   : > { %v239_v28 = vpop.xlane.xlu1 %238  ;;  %v236_v29 = vpop.xlane.xlu0 %235  ;;  %v410_v31 = vld [vmem:[#allocation3 + $0x8] sm:$0xff] }
  0xad   : > { %243 = vst.msk [vmem:[#allocation3 + $0x18] sm:$0xff] %vm223_vm1, %v239_v28  ;;  %242 = vst.msk [vmem:[#allocation3 + $0x10] sm:$0xff] %vm223_vm1, %v236_v29  ;;  %v1367_v32 = vpack.c.bf16 %v410_v31, %v409_v30  ;;  %v292_v29 = vmax.f32 %v290_v17, %v291_v23  ;;  %v301_v30 = vmax.f32 %v299_v18, %v300_v24  ;;  %v1452_v31 = vld [vmem:[%s1867_s3 + $0x1a0] ss:$8 sps:$4 sm:$0xff]  }
  0xae   : > { %v331_v34 = vld [vmem:[#allocation2 + $0x8] sm:$0xff] }
  0xaf   : > { %1368 = vmatpush3.bf16.msra.mxu1 %v1367_v32  ;;  %v1361_v35 = vpack.c.bf16 %v331_v34, %v330_v33  ;;  %v1460_v32 = vld [vmem:[%s1867_s3 + $0x1b4] ss:$8 sps:$4 sm:$0xff]   ;;  %v250_v33 = vadd.f32 %v249_v27, %v248_v21 }
  0xb0   : > { %1369 = vmatprep.subr.bf16.mxu1 %v1517_v16 }
  0xb1   : > { %1362 = vmatpush3.bf16.msra.mxu0 %v1361_v35  ;;  %v293_v35 = vrot.slane %v292_v29, 2 }
  0xb2   : > { %1363 = vmatprep.subr.bf16.mxu0 %v1517_v16  ;;  %v332_v36 = vld [vmem:[#allocation2 + $0x10] sm:$0xff]  ;;  %v333_v37 = vld [vmem:[#allocation2 + $0x18] sm:$0xff]  ;;  %v256_v16 = vrot.slane %v255_v10, 4 }
  0xb3   : > { %v1364_v38 = vpack.c.bf16 %v333_v37, %v332_v36  ;;  %v302_v36 = vrot.slane %v301_v30, 2  ;;  %v1458_v37 = vld [vmem:[%s1867_s3 + $0x1b0] ss:$8 sps:$4 sm:$0xff]  }
  0xb4   : > { %v411_v39 = vld [vmem:[#allocation3 + $0x10] sm:$0xff]  ;;  %v412_v40 = vld [vmem:[#allocation3 + $0x18] sm:$0xff]  ;;  %v257_v22 = vadd.f32 %v256_v16, %v255_v10 }
  0xb5   : > { %1365 = vmatpush3.bf16.msra.mxu0 %v1364_v38  ;;  %v1370_v41 = vpack.c.bf16 %v412_v40, %v411_v39  ;;  %v1466_v38 = vld [vmem:[%s1867_s3 + $0x1c4] ss:$8 sps:$4 sm:$0xff]   ;;  %v251_v39 = vrot.slane %v250_v33, 1 }
  0xb6   : > { %v258_v28 = vrot.slane %v257_v22, 2 }
  0xb7   : > { %1371 = vmatpush3.bf16.msra.mxu1 %v1370_v41  ;;  %v294_v41 = vmax.f32 %v292_v29, %v293_v35  ;;  %v1391_v29 = vld [vmem:[%s1867_s3 + $0x4] ss:$8 sps:$4 sm:$0xff]   ;;  %v329_v35 = vld [vmem:[%s1866_s2 + $0x18] sm:$0xff] }
  0xb8   : > { %1339 = vmatmul.mubr.msk.f32.vlgmr.msra.gmra.mrb[0].mxu0 %vm334_vm2, %v325_v42  ;;  %1058 = vmatprep.subr.bf16.mxu1 %v1394_v45  ;;  %v259_v34 = vadd.f32 %v258_v28, %v257_v22  ;;  %v252_v45 = vadd.f32 %v251_v39, %v250_v33  ;;  %v328_v33 = vld [vmem:[%s1866_s2 + $0x10] sm:$0xff]  ;;  %v1401_v39 = vld [vmem:[%s1867_s3 + $0x20] ss:$8 sps:$4 sm:$0xff]  }
  0xb9   : > { %1354 = vmatprep.mubr.msk.f32.mxu0 %vm485_vm3, %v326_v43  ;;  %v1464_v43 = vld [vmem:[%s1867_s3 + $0x1c0] ss:$8 sps:$4 sm:$0xff]  }
  0xba   : > { %1350 = vmatmul.mubr.msk.f32.vlgmr.msra.gmra.mrb[0].mxu1 %vm334_vm2, %v325_v42  ;;  %v260_v40 = vrot.slane %v259_v34, 1  ;;  %v303_v42 = vmax.f32 %v301_v30, %v302_v36  ;;  %v327_v30 = vld [vmem:[%s1866_s2 + $0x8] sm:$0xff]  ;;  %v1395_v36 = vld [vmem:[%s1867_s3 + $0x10] ss:$8 sps:$4 sm:$0xff]  }
  0xbb   : > { %1059 = vmatpush1.bf16.msra.mxu1 %v1392_v44  ;;  %v1472_v44 = vld [vmem:[%s1867_s3 + $0x1d4] ss:$8 sps:$4 sm:$0xff]  }
  0xbc   : > { %1060 = vmatprep.subr.bf16.mxu1 %v1400_v46  ;;  %v261_v46 = vadd.f32 %v260_v40, %v259_v34  ;;  %v1397_v34 = vld [vmem:[%s1867_s3 + $0x14] ss:$8 sps:$4 sm:$0xff]  }
  0xbd   : > { %v1409_v40 = vld [vmem:[%s1867_s3 + $0x34] ss:$8 sps:$4 sm:$0xff]  }
  0xbf   : > { %1061 = vmatpush1.bf16.msra.mxu1 %v1398_v47  ;;  %v295_v47 = vrot.slane %v294_v41, 1 }
  0xc0   : > { %1062 = vmatprep.subr.bf16.mxu1 %v1406_v48  ;;  %v304_v48 = vrot.slane %v303_v42, 1 }
  0xc3   : > { %1063 = vmatpush1.bf16.msra.mxu1 %v1404_v49  ;;  %v1470_v49 = vld [vmem:[%s1867_s3 + $0x1d0] ss:$8 sps:$4 sm:$0xff]  }
  0xc4   : > { %1064 = vmatprep.subr.bf16.mxu1 %v1412_v50  ;;  %v1478_v50 = vld [vmem:[%s1867_s3 + $0x1e4] ss:$8 sps:$4 sm:$0xff]  }
  0xc7   : > { %1065 = vmatpush1.bf16.msra.mxu1 %v1410_v51  ;;  %v263_v51 = vmul.f32 0.03125, %v252_v45  ;;  %v1419_v45 = vld [vmem:[%s1867_s3 + $0x50] ss:$8 sps:$4 sm:$0xff]  }
  0xc8   : > { %1066 = vmatprep.subr.bf16.mxu1 %v1418_v52  ;;  %v264_v52 = vmul.f32 0.03125, %v261_v46  ;;  %v1427_v46 = vld [vmem:[%s1867_s3 + $0x64] ss:$8 sps:$4 sm:$0xff]  }
  0xcb   : > { %1067 = vmatpush1.bf16.msra.mxu1 %v1416_v53  ;;  %v296_v53 = vmax.f32 %v294_v41, %v295_v47  ;;  %v1407_v41 = vld [vmem:[%s1867_s3 + $0x30] ss:$8 sps:$4 sm:$0xff]   ;;  %v1425_v47 = vld [vmem:[%s1867_s3 + $0x60] ss:$8 sps:$4 sm:$0xff]  }
  0xcc   : > { %1068 = vmatprep.subr.bf16.mxu1 %v1424_v54  ;;  %v305_v54 = vmax.f32 %v303_v42, %v304_v48  ;;  %v1415_v42 = vld [vmem:[%s1867_s3 + $0x44] ss:$8 sps:$4 sm:$0xff]   ;;  %v1433_v48 = vld [vmem:[%s1867_s3 + $0x74] ss:$8 sps:$4 sm:$0xff]  }
  0xcf   : > { %1069 = vmatpush1.bf16.msra.mxu1 %v1422_v57  ;;  %v271_v57 = vlaneseq }
  0xd0   : > { %1070 = vmatprep.subr.bf16.mxu1 %v1430_v58  ;;  %v1520_v58 = vmov 1966171168  }
  0xd1   : > { %v269_v59 = vunpack.c.l.s4 %v1520_v58  ;;  %v1719_v60 = vshrl.u32 %v271_v57, 7  ;;  %vm285_vm4 = vcmp.lt.s32.totalorder %v271_v57, 256  ;;  %v1455_v57 = vld [vmem:[%s1867_s3 + $0xb0] ss:$8 sps:$4 sm:$0xff]   ;;  %v1463_v58 = vld [vmem:[%s1867_s3 + $0xc4] ss:$8 sps:$4 sm:$0xff]  }
  0xd3   : > { %1071 = vmatpush1.bf16.msra.mxu1 %v1428_v61  ;;  %v267_v61 = vcombine.low %v263_v51, %v264_v52  ;;  %v270_v3 = vunpack.c.0.s8 %v269_v59  ;;  %v619_v15 = vsub.s32 2, %v1719_v60  ;;  %v1437_v51 = vld [vmem:[%s1867_s3 + $0x80] ss:$8 sps:$4 sm:$0xff]   ;;  %v1445_v52 = vld [vmem:[%s1867_s3 + $0x94] ss:$8 sps:$4 sm:$0xff]  }
  0xd4   : > { %1072 = vmatprep.subr.bf16.mxu1 %v1436_v62  ;;  %v308_v62 = vcombine.low %v296_v53, %v305_v54  ;;  %v1443_v53 = vld [vmem:[%s1867_s3 + $0x90] ss:$8 sps:$4 sm:$0xff]   ;;  %v1451_v54 = vld [vmem:[%s1867_s3 + $0xa4] ss:$8 sps:$4 sm:$0xff]   ;;  %v1461_v59 = vld [vmem:[%s1867_s3 + $0xc0] ss:$8 sps:$4 sm:$0xff]  }
  0xd5   : > { %v273_v4 = vsub.s32 %v270_v3, %v1719_v60  ;;  %v1833_v3 = vsub.s32 0, %v1719_v60 }
  0xd7   : > { %1073 = vmatpush1.bf16.msra.mxu1 %v1434_v13  ;;  %v274_v10 = vrot.slane %v267_v61, %v273_v4  ;;  %v315_v11 = vrot.slane %v308_v62, %v273_v4  ;;  %v1469_v61 = vld [vmem:[%s1867_s3 + $0xd4] ss:$8 sps:$4 sm:$0xff]   ;;  %v1467_v62 = vld [vmem:[%s1867_s3 + $0xd0] ss:$8 sps:$4 sm:$0xff]  }
  0xd8   : > { %1074 = vmatprep.subr.bf16.mxu1 %v1442_v14  ;;  %v623_v14 = vsub.s32 3, %v1719_v60 }
  0xd9   : > { %v281_v12 = vrot.slane %v274_v10, %v273_v4  ;;  %v322_v13 = vrot.slane %v315_v11, %v273_v4  ;;  %v1473_v4 = vld [vmem:[%s1867_s3 + $0xe0] ss:$8 sps:$4 sm:$0xff]   ;;  %v1481_v10 = vld [vmem:[%s1867_s3 + $0xf4] ss:$8 sps:$4 sm:$0xff]  }
  0xdb   : > { %1075 = vmatpush1.bf16.msra.mxu1 %v1440_v19  ;;  %287 = vst.msk [vmem:[#allocation4] sm:$0x3] %vm285_vm4, %v281_v12  ;;  %324 = vst.msk [vmem:[#allocation4 + $0x2] sm:$0x3] %vm285_vm4, %v322_v13  ;;  %v1479_v12 = vld [vmem:[%s1867_s3 + $0xf0] ss:$8 sps:$4 sm:$0xff]  }
  0xdc   : > { %1076 = vmatprep.subr.bf16.mxu1 %v1448_v20  ;;  %v1521_v13 = vmov 0  }
  0xdd   : > { %1388 = vset.pattern.permute.xlu1 %v1521_v13  ;;  %1387 = vset.pattern.permute.xlu0 %v1521_v13 }
  0xdf   : > { %1077 = vmatpush1.bf16.msra.mxu1 %v1446_v25  ;;  %v615_v25 = vsub.s32 1, %v1719_v60 }
  0xe0   : > { %1078 = vmatprep.subr.bf16.mxu1 %v1454_v26 }
  0xe2   : > { %v1727_v16 = vld [vmem:[#allocation4] sm:$0xf] }
  0xe3   : > { %1079 = vmatpush1.bf16.msra.mxu1 %v1452_v31  ;;  %v624_v17 = vrot.slane %v1727_v16, %v623_v14  ;;  %v620_v18 = vrot.slane %v1727_v16, %v619_v15  ;;  %v1389_v31 = vld [vmem:[%s1867_s3] ss:$8 sps:$4 sm:$0xff]   ;;  %v612_v11 = vrot.slane %v1727_v16, %v1833_v3 }
  0xe4   : > { %1080 = vmatprep.subr.bf16.mxu1 %v1460_v32  ;;  %v616_v32 = vrot.slane %v1727_v16, %v615_v25 }
  0xe5   : > { %v632_v19 = vpack.c.bf16 %v624_v17, %v624_v17  ;;  %v631_v20 = vpack.c.bf16 %v620_v18, %v620_v18  ;;  %v629_v60 = vpack.c.bf16 %v612_v11, %v612_v11 }
  0xe7   : > { %1081 = vmatpush1.bf16.msra.mxu1 %v1458_v37  ;;  %1090 = vmatprep.mubr.bf16.mxu1 %v632_v19  ;;  %v630_v37 = vpack.c.bf16 %v616_v32, %v616_v32 }
  0xe8   : > { %1082 = vmatprep.subr.bf16.mxu1 %v1466_v38  ;;  %v1403_v38 = vld [vmem:[%s1867_s3 + $0x24] ss:$8 sps:$4 sm:$0xff]  }
  0xeb   : > { %1083 = vmatpush1.bf16.msra.mxu1 %v1464_v43  ;;  %v1413_v43 = vld [vmem:[%s1867_s3 + $0x40] ss:$8 sps:$4 sm:$0xff]  }
  0xec   : > { %1084 = vmatprep.subr.bf16.mxu1 %v1472_v44  ;;  %v1421_v44 = vld [vmem:[%s1867_s3 + $0x54] ss:$8 sps:$4 sm:$0xff]  }
  0xef   : > { %1085 = vmatpush1.bf16.msra.mxu1 %v1470_v49  ;;  %v1431_v49 = vld [vmem:[%s1867_s3 + $0x70] ss:$8 sps:$4 sm:$0xff]  }
  0xf0   : > { %1086 = vmatprep.subr.bf16.mxu1 %v1478_v50  ;;  %v1439_v50 = vld [vmem:[%s1867_s3 + $0x84] ss:$8 sps:$4 sm:$0xff]  }
  0xf3   : > { %1087 = vmatpush1.bf16.msra.mxu1 %v1476_v55  ;;  %v1449_v55 = vld [vmem:[%s1867_s3 + $0xa0] ss:$8 sps:$4 sm:$0xff]  }
  0xf4   : > { %1088 = vmatprep.subr.bf16.mxu1 %v1484_v56  ;;  %v1457_v56 = vld [vmem:[%s1867_s3 + $0xb4] ss:$8 sps:$4 sm:$0xff]  }
  0xf7   : > { %1089 = vmatpush1.bf16.msra.mxu1 %v1482_v63  ;;  %v1475_v63 = vld [vmem:[%s1867_s3 + $0xe4] ss:$8 sps:$4 sm:$0xff]  }
  0xfa   : > { %1091 = vmatmul.mubr.bf16.vlgmr.msra.gmra.mrb[4].mxu1 %v631_v20 }
 0x18b   : > { %v404_v21 = vpop.f32.mrb[0].mxu0 }
 0x18c   : > { %v408_v22 = vmax.f32 %v404_v21, 0.0  ;;  %v1340_v23 = vpop.f32.mrb[1].mxu0 }
 0x18d   : > { %v479_v24 = vpop.f32.mrb[0].mxu1 }
 0x18e   : > { %v483_v26 = vmax.f32 %v479_v24, 0.0  ;;  %v1351_v27 = vpop.f32.mrb[1].mxu1 }
 0x190   : > { %v484_v28 = vadd.f32 %v483_v26, %v408_v22 }
 0x192   : > { %1352 = vmatprep.subr.mxu0 %v484_v28 }
 0x193   : > { %1353 = vmatpush3.msra.mxu0 %v484_v28 }
 0x194   : > { %1355 = vmatmul.mubr.msk.f32.vlgmr.msra.gmra.mrb[2].mxu0 %vm485_vm3, %v327_v30  ;;  %1017 = vmatprep.subr.bf16.mxu0 %v1391_v29 }
 0x195   : > { %1357 = vmatprep.mubr.msk.f32.mxu0 %vm485_vm3, %v328_v33  ;;  %1018 = vmatpush1.bf16.msra.mxu0 %v1389_v31 }
 0x196   : > { %1019 = vmatprep.subr.bf16.mxu0 %v1397_v34 }
 0x198   : > { %1358 = vmatmul.mubr.msk.f32.gmra.mrb[4].mxu0 %vm485_vm3, %v329_v35 }
 0x199   : > { %1020 = vmatpush1.bf16.msra.mxu0 %v1395_v36  ;;  %1049 = vmatprep.mubr.bf16.mxu0 %v630_v37 }
 0x19a   : > { %1021 = vmatprep.subr.bf16.mxu0 %v1403_v38 }
 0x19d   : > { %1022 = vmatpush1.bf16.msra.mxu0 %v1401_v39 }
 0x19e   : > { %1023 = vmatprep.subr.bf16.mxu0 %v1409_v40 }
 0x1a1   : > { %1024 = vmatpush1.bf16.msra.mxu0 %v1407_v41 }
 0x1a2   : > { %1025 = vmatprep.subr.bf16.mxu0 %v1415_v42 }
 0x1a5   : > { %1026 = vmatpush1.bf16.msra.mxu0 %v1413_v43 }
 0x1a6   : > { %1027 = vmatprep.subr.bf16.mxu0 %v1421_v44 }
 0x1a9   : > { %1028 = vmatpush1.bf16.msra.mxu0 %v1419_v45 }
 0x1aa   : > { %1029 = vmatprep.subr.bf16.mxu0 %v1427_v46 }
 0x1ad   : > { %1030 = vmatpush1.bf16.msra.mxu0 %v1425_v47 }
 0x1ae   : > { %1031 = vmatprep.subr.bf16.mxu0 %v1433_v48 }
 0x1b1   : > { %1032 = vmatpush1.bf16.msra.mxu0 %v1431_v49 }
 0x1b2   : > { %1033 = vmatprep.subr.bf16.mxu0 %v1439_v50 }
 0x1b5   : > { %1034 = vmatpush1.bf16.msra.mxu0 %v1437_v51 }
 0x1b6   : > { %1035 = vmatprep.subr.bf16.mxu0 %v1445_v52 }
 0x1b9   : > { %1036 = vmatpush1.bf16.msra.mxu0 %v1443_v53 }
 0x1ba   : > { %1037 = vmatprep.subr.bf16.mxu0 %v1451_v54 }
 0x1bd   : > { %1038 = vmatpush1.bf16.msra.mxu0 %v1449_v55 }
 0x1be   : > { %1039 = vmatprep.subr.bf16.mxu0 %v1457_v56 }
 0x1c1   : > { %1040 = vmatpush1.bf16.msra.mxu0 %v1455_v57 }
 0x1c2   : > { %1041 = vmatprep.subr.bf16.mxu0 %v1463_v58 }
 0x1c5   : > { %1042 = vmatpush1.bf16.msra.mxu0 %v1461_v59 }
 0x1c6   : > { %1043 = vmatprep.subr.bf16.mxu0 %v1469_v61 }
 0x1c9   : > { %1044 = vmatpush1.bf16.msra.mxu0 %v1467_v62 }
 0x1ca   : > { %1045 = vmatprep.subr.bf16.mxu0 %v1475_v63 }
 0x1cd   : > { %1046 = vmatpush1.bf16.msra.mxu0 %v1473_v4  ;;  %v1092_v14 = vpop.f32.mrb[4].mxu1 }
 0x1ce   : > { %1047 = vmatprep.subr.bf16.mxu0 %v1481_v10  ;;  %v1094_v15 = vpop.f32.mrb[5].mxu1 }
 0x1cf   : > { %v1096_v17 = vpop.f32.mrb[6].mxu1 }
 0x1d0   : > { %v1097_v18 = vpop.f32.mrb[7].mxu1 }
 0x1d1   : > { %1048 = vmatpush1.bf16.msra.mxu0 %v1479_v12 }
 0x1d4   : > { %1050 = vmatmul.mubr.bf16.vlgmr.msra.gmra.mrb[8].mxu0 %v629_v60 }
 0x267   : > { %v1356_v19 = vpop.f32.mrb[2].mxu0 }
 0x268   : > { %v1242_v20 = vmul.f32 -1.442695, %v1356_v19  ;;  %v564_v21 = vpop.f32.mrb[3].mxu0 }
 0x269   : > { %v1241_v16 = vmul.f32 -1.442695, %v564_v21 }
 0x26a   : > { %1485 = vpow2.f32 %v1242_v20 }
 0x26b   : > { %1487 = vpow2.f32 %v1241_v16  ;;  %v1359_v22 = vpop.f32.mrb[4].mxu0 }
 0x26c   : > { %v1244_v23 = vmul.f32 -1.442695, %v1359_v22  ;;  %v574_v24 = vpop.f32.mrb[5].mxu0 }
 0x26d   : > { %v1243_v25 = vmul.f32 -1.442695, %v574_v24 }
 0x26e   : > { %1489 = vpow2.f32 %v1244_v23 }
 0x26f   : > { %1491 = vpow2.f32 %v1243_v25 }
 0x274   : > { %v1486_v26 = vpop.eup %1485 }
 0x275   : > { %v1488_v27 = vpop.eup %1487  ;;  %v596_v28 = vadd.f32 1.0, %v1486_v26 }
 0x276   : > { %v595_v29 = vadd.f32 1.0, %v1488_v27 }
 0x277   : > { %1493 = vrcp.f32 %v596_v28 }
 0x278   : > { %v1490_v30 = vpop.eup %1489  ;;  %1495 = vrcp.f32 %v595_v29 }
 0x279   : > { %v1492_v31 = vpop.eup %1491  ;;  %v598_v33 = vadd.f32 1.0, %v1490_v30 }
 0x27a   : > { %v597_v32 = vadd.f32 1.0, %v1492_v31 }
 0x27c   : > { %1497 = vrcp.f32 %v597_v32 }
 0x27d   : > { %1499 = vrcp.f32 %v598_v33 }
 0x281   : > { %v1494_v34 = vpop.eup %1493 }
 0x282   : > { %v1496_v35 = vpop.eup %1495  ;;  %1126 = vperm.xlu1 %1388, %v1494_v34  }
 0x283   : > { %1121 = vperm.xlu0 %1387, %v1496_v35  }
 0x286   : > { %v1498_v36 = vpop.eup %1497 }
 0x287   : > { %1131 = vperm.xlu1 %1388, %v1498_v36   ;;  %v1500_v37 = vpop.eup %1499 }
 0x28b   : > { %1136 = vperm.xlu1 %1388, %v1500_v37  }
 0x2a7   : > { %v1051_v38 = vpop.f32.mrb[8].mxu0 }
 0x2a8   : > { %v1093_v39 = vadd.f32 %v1092_v14, %v1051_v38  ;;  %v1053_v40 = vpop.f32.mrb[9].mxu0 }
 0x2a9   : > { %v1095_v41 = vadd.f32 %v1094_v15, %v1053_v40  ;;  %v1055_v42 = vpop.f32.mrb[10].mxu0 }
 0x2aa   : > { %v1056_v43 = vpop.f32.mrb[11].mxu0  ;;  %v1309_v44 = vmul.f32 -1.442695, %v1093_v39 }
 0x2ab   : > { %v1310_v45 = vmul.f32 -1.442695, %v1095_v41 }
 0x2ac   : > { %1501 = vpow2.f32 %v1309_v44 }
 0x2ad   : > { %1503 = vpow2.f32 %v1310_v45 }
 0x2b6   : > { %v1502_v46 = vpop.eup %1501 }
 0x2b7   : > { %v1504_v47 = vpop.eup %1503  ;;  %v1105_v48 = vadd.f32 1.0, %v1502_v46 }
 0x2b8   : > { %v1106_v49 = vadd.f32 1.0, %v1504_v47 }
 0x2b9   : > { %1505 = vrcp.f32 %v1105_v48 }
 0x2ba   : > { %1507 = vrcp.f32 %v1106_v49 }
 0x2c3   : > { %v1506_v50 = vpop.eup %1505 }
 0x2c4   : > { %v1508_v51 = vpop.eup %1507  ;;  %v1150_v52 = vrot.slane %v1506_v50, %v1833_v3 }
 0x2c5   : > { %v1154_v53 = vrot.slane %v1508_v51, %v1833_v3 }
 0x301   : > { %v1127_v54 = vpop.permute.xlu1 %1126 }
 0x302   : > { %v1141_v55 = vmul.f32 %v1127_v54, %v1567_v2  ;;  %v1142_v56 = vmul.f32 %v1127_v54, %v1573_v5  ;;  %v1122_v57 = vpop.permute.xlu0 %1121 }
 0x303   : > { %v1139_v58 = vmul.f32 %v1122_v57, %v1563_v0  ;;  %v1140_v59 = vmul.f32 %v1122_v57, %v1565_v1 }
 0x304   : > { %v1157_v61 = vmul.f32 %v1150_v52, %v1141_v55  ;;  %v1158_v62 = vmul.f32 %v1154_v53, %v1142_v56 }
 0x305   : > { %v1155_v63 = vmul.f32 %v1150_v52, %v1139_v58  ;;  %v1156_v4 = vmul.f32 %v1154_v53, %v1140_v59 }
 0x306   : > { %1165 = vst [vmem:[%s197_s23 + $0x10] sm:$0xff] %v1157_v61  ;;  %1166 = vst [vmem:[%s197_s23 + $0x18] sm:$0xff] %v1158_v62  ;;  %v1132_v3 = vpop.permute.xlu1 %1131 }
 0x307   : > { %1163 = vst [vmem:[%s197_s23] sm:$0xff] %v1155_v63  ;;  %1164 = vst [vmem:[%s197_s23 + $0x8] sm:$0xff] %v1156_v4  ;;  %v1143_v2 = vmul.f32 %v1132_v3, %v1579_v8  ;;  %v1144_v5 = vmul.f32 %v1132_v3, %v1581_v9 }
 0x309   : > { %v1159_v10 = vmul.f32 %v1150_v52, %v1143_v2  ;;  %v1160_v11 = vmul.f32 %v1154_v53, %v1144_v5 }
 0x30a   : > { %v1137_v12 = vpop.permute.xlu1 %1136 }
 0x30b   : > { %1167 = vst [vmem:[%s197_s23 + $0x20] sm:$0xff] %v1159_v10  ;;  %1168 = vst [vmem:[%s197_s23 + $0x28] sm:$0xff] %v1160_v11  ;;  %v1145_v0 = vmul.f32 %v1137_v12, %v1575_v6  ;;  %v1146_v1 = vmul.f32 %v1137_v12, %v1577_v7 }
 0x30d   : > { %v1161_v60 = vmul.f32 %v1150_v52, %v1145_v0  ;;  %v1162_v13 = vmul.f32 %v1154_v53, %v1146_v1 }
 0x30f   : > { %1169 = vst [vmem:[%s197_s23 + $0x30] sm:$0xff] %v1161_v60  ;;  %1170 = vst [vmem:[%s197_s23 + $0x38] sm:$0xff] %v1162_v13 }
 0x310 PF: > { %s14_s15 = sadd.s32 1, %s1515_s15  }
 0x311   : > { %p11_p4 = scmp.ge.s32.totalorder %s14_s15, 4  }
 0x313   :  { %13 = sbr.rel (!%p11_p4) target bundleno = 1 (0x1), region = 66 }

</bundles_post_ra>
